<compile_context>
chip_gen: v7x
topology: tpu7x:2x2x1
jax: 0.10.0
libtpu: 0.0.40
codegen_flags: <defaults>
</compile_context>

<pallas_src>
import jax
import jax.numpy as jnp
from jax.experimental import pallas as pl
from jax.experimental.pallas import tpu as pltpu


def _round_up(x, m):
    return (x + m - 1) // m * m


def _hyper_agg_kernel(alpha_ref, last_ref, delta_ref, du_ref, out_ref):
    # alpha_ref: (K, 1) f32, already clamped to [0, 1] in the wrapper.
    # last_ref / delta_ref / out_ref: (K, tile_d); du_ref: (1, tile_d).
    a = alpha_ref[...]                                    # (K, 1)
    du = du_ref[...].astype(jnp.float32)                  # (1, tile_d)
    res = (last_ref[...].astype(jnp.float32)
           + delta_ref[...].astype(jnp.float32)
           + a * du)                                      # (K, tile_d)
    out_ref[...] = res.astype(out_ref.dtype)


def hyper_agg_weight(alpha, last_params, deltas, delta_update, *,
                     vmem_budget_bytes=20 << 20):
    """Pallas implementation of HyperAggWeight.forward.

    Args:
      alpha:        (K,)  learnable per-client weights (clamped to [0, 1]).
      last_params:  (K, D) stacked flatten_last_param_list.
      deltas:       (K, D) stacked flatten_delta.
      delta_update: (D,)   shared flatten_delta_update.
    Returns:
      (K, D) stacked flatten_new_param_list.
    """
    K, D = last_params.shape
    assert alpha.shape == (K,)
    assert deltas.shape == (K, D)
    assert delta_update.shape == (D,)

    LANE = 128
    SUBLANE = 8
    itemsize = jnp.dtype(last_params.dtype).itemsize

    # Double-buffered VMEM footprint per lane: 4 "big" streams (last, delta,
    # out, each K rows padded to 8 sublanes in VMEM) + delta_update (1 row,
    # also padded to 8 sublanes).
    rows_pad = _round_up(K, SUBLANE)
    bytes_per_lane = 2 * (3 * rows_pad + rows_pad + SUBLANE) * itemsize
    max_tile = max(LANE, (vmem_budget_bytes // bytes_per_lane) // LANE * LANE)

    # Lane tile selection: keep it a multiple of 128 (or equal to the full
    # array dim) so the BlockSpec is legal; Pallas masks the ragged last block.
    if D % LANE == 0:
        tile_d = min(max_tile, D)
    elif D <= max_tile:
        tile_d = D            # single full-width block (equals the array dim)
    else:
        tile_d = max_tile     # 128-multiple; last partial block is masked

    grid = (pl.cdiv(D, tile_d),)

    # clamp(alpha, 0, 1) hoisted out of the kernel: done once, not per step.
    alpha2 = jnp.clip(alpha.astype(jnp.float32), 0.0, 1.0).reshape(K, 1)
    du2 = delta_update.reshape(1, D)   # tiny relative to the K*D streams

    vmem_needed = bytes_per_lane * tile_d + (256 << 10)
    vmem_limit = int(min(max(vmem_needed, 16 << 20), 48 << 20))

    return pl.pallas_call(
        _hyper_agg_kernel,
        out_shape=jax.ShapeDtypeStruct((K, D), last_params.dtype),
        grid=grid,
        in_specs=[
            pl.BlockSpec((K, 1), lambda j: (0, 0)),        # alpha (tiny, resident)
            pl.BlockSpec((K, tile_d), lambda j: (0, j)),   # last_params
            pl.BlockSpec((K, tile_d), lambda j: (0, j)),   # deltas
            pl.BlockSpec((1, tile_d), lambda j: (0, j)),   # delta_update
        ],
        out_specs=pl.BlockSpec((K, tile_d), lambda j: (0, j)),
        compiler_params=pltpu.CompilerParams(
            dimension_semantics=("parallel",),
            vmem_limit_bytes=vmem_limit),
    )(alpha2, last_params, deltas, du2)


def _reference(alpha, last_params, deltas, delta_update):
    K, D = last_params.shape
    a = jnp.clip(alpha, 0.0, 1.0).reshape(K, 1)
    return last_params + deltas + a * delta_update.reshape(1, D)


if __name__ == "__main__":
    K = 4          # number of clients / encoders
    D = 3000       # flattened parameter dim (deliberately not 8*128-aligned)

    key = jax.random.PRNGKey(0)
    k0, k1, k2, k3 = jax.random.split(key, 4)

    # alpha spread outside [0, 1] so the clamp path is exercised.
    alpha = jax.random.uniform(k0, (K,), dtype=jnp.float32, minval=-0.5, maxval=1.5)
    last_params = jax.random.normal(k1, (K, D), dtype=jnp.float32)
    deltas = jax.random.normal(k2, (K, D), dtype=jnp.float32)
    delta_update = jax.random.normal(k3, (D,), dtype=jnp.float32)

    out = hyper_agg_weight(alpha, last_params, deltas, delta_update)
    out = jax.block_until_ready(out)

    ref = _reference(alpha, last_params, deltas, delta_update)
    assert out.shape == (K, D)
    assert jnp.allclose(out, ref, atol=1e-6, rtol=1e-6), "mismatch vs reference"

    # Second check: force a multi-step grid with a ragged (masked) last block.
    D2 = 4160      # not a multiple of 128
    j0, j1, j2 = jax.random.split(k3, 3)
    lp2 = jax.random.normal(j0, (K, D2), dtype=jnp.float32)
    dl2 = jax.random.normal(j1, (K, D2), dtype=jnp.float32)
    du2 = jax.random.normal(j2, (D2,), dtype=jnp.float32)
    out2 = hyper_agg_weight(alpha, lp2, dl2, du2, vmem_budget_bytes=640 << 10)
    out2 = jax.block_until_ready(out2)
    ref2 = _reference(alpha, lp2, dl2, du2)
    assert jnp.allclose(out2, ref2, atol=1e-6, rtol=1e-6), "mismatch (multi-block)"

    print("KERNEL_OK")
</pallas_src>

<mosaic_0001>
module attributes {stable_mosaic.version = 11 : i64} {
  func.func @_hyper_agg_kernel(%arg0: i32, %arg1: memref<4x1xf32, #tpu.memory_space<vmem>>, %arg2: memref<4x3000xf32, #tpu.memory_space<vmem>>, %arg3: memref<4x3000xf32, #tpu.memory_space<vmem>>, %arg4: memref<1x3000xf32, #tpu.memory_space<vmem>>, %arg5: memref<4x3000xf32, #tpu.memory_space<vmem>>) attributes {dimension_semantics = [#tpu.dimension_semantics<parallel>], iteration_bounds = array<i64: 1>, scalar_prefetch = 0 : i64, scratch_operands = 0 : i64, tpu.core_type = #tpu.core_type<tc>, window_params = [{pipeline_mode = #tpu.pipeline_mode<synchronous>, transform_indices = @transform_0, window_bounds = array<i64: 4, 1>}, {transform_indices = @transform_1, window_bounds = array<i64: 4, 3000>}, {transform_indices = @transform_2, window_bounds = array<i64: 4, 3000>}, {transform_indices = @transform_3, window_bounds = array<i64: 1, 3000>}, {transform_indices = @transform_4, window_bounds = array<i64: 4, 3000>}]} {
    %c0 = arith.constant 0 : index
    %c0_0 = arith.constant 0 : index
    %0 = vector.load %arg1[%c0, %c0_0] : memref<4x1xf32, #tpu.memory_space<vmem>>, vector<4x1xf32>
    %c0_1 = arith.constant 0 : index
    %c0_2 = arith.constant 0 : index
    %1 = vector.load %arg4[%c0_1, %c0_2] : memref<1x3000xf32, #tpu.memory_space<vmem>>, vector<1x3000xf32>
    %c0_3 = arith.constant 0 : index
    %c0_4 = arith.constant 0 : index
    %2 = vector.load %arg2[%c0_3, %c0_4] : memref<4x3000xf32, #tpu.memory_space<vmem>>, vector<4x3000xf32>
    %c0_5 = arith.constant 0 : index
    %c0_6 = arith.constant 0 : index
    %3 = vector.load %arg3[%c0_5, %c0_6] : memref<4x3000xf32, #tpu.memory_space<vmem>>, vector<4x3000xf32>
    %4 = arith.addf %2, %3 : vector<4x3000xf32>
    %5 = vector.broadcast %0 : vector<4x1xf32> to vector<4x3000xf32>
    %6 = vector.broadcast %1 : vector<1x3000xf32> to vector<4x3000xf32>
    %7 = arith.mulf %5, %6 : vector<4x3000xf32>
    %8 = arith.addf %4, %7 : vector<4x3000xf32>
    %c0_7 = arith.constant 0 : index
    %c0_8 = arith.constant 0 : index
    %9 = vector.load %arg5[%c0_7, %c0_8] : memref<4x3000xf32, #tpu.memory_space<vmem>>, vector<4x3000xf32>
    tpu.vector_store %arg5[%c0_7, %c0_8], %8 {strides = array<i32>} : memref<4x3000xf32, #tpu.memory_space<vmem>>, vector<4x3000xf32>,
    return
  }
  func.func @transform_0(%arg0: i32) -> (i32, i32) {
    %c0_i32 = arith.constant 0 : i32
    %c0_i32_0 = arith.constant 0 : i32
    %c0_i32_1 = arith.constant 0 : i32
    return %c0_i32, %c0_i32_0 : i32, i32
  }
  func.func @transform_1(%arg0: i32) -> (i32, i32) {
    %c0_i32 = arith.constant 0 : i32
    %c0_i32_0 = arith.constant 0 : i32
    return %c0_i32, %arg0 : i32, i32
  }
  func.func @transform_2(%arg0: i32) -> (i32, i32) {
    %c0_i32 = arith.constant 0 : i32
    %c0_i32_0 = arith.constant 0 : i32
    return %c0_i32, %arg0 : i32, i32
  }
  func.func @transform_3(%arg0: i32) -> (i32, i32) {
    %c0_i32 = arith.constant 0 : i32
    %c0_i32_0 = arith.constant 0 : i32
    return %c0_i32, %arg0 : i32, i32
  }
  func.func @transform_4(%arg0: i32) -> (i32, i32) {
    %c0_i32 = arith.constant 0 : i32
    %c0_i32_0 = arith.constant 0 : i32
    return %c0_i32, %arg0 : i32, i32
  }
}

</mosaic_0001>

<bundles_post_ra>
// kernel: tpu_custom_call.1
= control target key start
LH: loop header
LB: loop body
LE: loop exit
PB: predicated region body
PF: predicated region fallthrough
CT: control target
= control target key end

     0   :  { %9 = vsyncpa [#allocation3], 0  ;;  %s595_s0 = inlined_call_operand.vmem [shape: f32[4,1], index: 0, kind: input, shape index: {}]   ;;  %s596_s1 = inlined_call_operand.hbm [shape: f32[4,3000], index: 1, kind: input, shape index: {}]   ;;  %s597_s2 = inlined_call_operand.hbm [shape: f32[4,3000], index: 2, kind: input, shape index: {}]   ;;  %s598_s3 = inlined_call_operand.hbm [shape: f32[1,3000], index: 3, kind: input, shape index: {}]   ;;  %s599_s4 = inlined_call_operand.hbm [shape: f32[4,3000], index: 4, kind: output, shape index: {}]  }
   0x1   :  { %10 = vsyncpa [#allocation6], 0 }
   0x2   :  { %11 = vsyncpa [#allocation4], 0  ;;  %s436_s15 = smov [#allocation5]   ;;  %s437_s17 = smov [#allocation2]  }
   0x3   :  { %s30_s16 = sshll.u32 %s436_s15, 4  ;;  %s20_s18 = sshll.u32 %s437_s17, 4  ;;  %s31_s16 = int_to_ptr.vmem [resolvable:$true] %s30_s16  ;;  %s21_s18 = int_to_ptr.vmem [resolvable:$true] %s20_s18 }
   0x4   :  { %s342_s21 = scalar_lea.hbm %s597_s2, 1536 }
   0x5   :  { %p343_p0 = scmp.ne.s32.totalorder %s597_s2, %s342_s21  ;;  %p346_p1 = scmp.lt.u32.totalorder %s342_s21, %s597_s2 }
   0x7   :  { %p348_p2 = pnand %p346_p1, %p343_p0 }
   0x9   :  { %351 = shalt.err (!%p348_p2)
}
   0xa   :  { %s352_s26 = scalar_lea.vmem %s31_s16, 1536  ;;  %p357_p4 = scmp.lt.s32.totalorder %s31_s16, %s31_s16 }
   0xb   :  { %p353_p3 = scmp.ne.s32.totalorder %s31_s16, %s352_s26  ;;  %p358_p5 = scmp.lt.s32.totalorder %s352_s26, %s352_s26 }
   0xd   :  { %p359_p6 = por %p358_p5, %p357_p4 }
   0xf   :  { %p360_p7 = pnand %p359_p6, %p353_p3 }
  0x11   :  { %363 = shalt.err (!%p360_p7)
}
  0x12   :  { %33 = dma.hbm_to_vmem [thread:$0]  %s597_s2, 1536, %s31_s16, [#allocation6]  }
  0x13   :  { %s364_s5 = scalar_lea.hbm %s596_s1, 1536 }
  0x14   :  { %p365_p8 = scmp.ne.s32.totalorder %s596_s1, %s364_s5  ;;  %p368_p9 = scmp.lt.u32.totalorder %s364_s5, %s596_s1 }
  0x16   :  { %p370_p10 = pnand %p368_p9, %p365_p8 }
  0x18   :  { %373 = shalt.err (!%p370_p10)
}
  0x19   :  { %s374_s10 = scalar_lea.vmem %s21_s18, 1536  ;;  %p379_p12 = scmp.lt.s32.totalorder %s21_s18, %s21_s18 }
  0x1a   :  { %p375_p11 = scmp.ne.s32.totalorder %s21_s18, %s374_s10  ;;  %p380_p13 = scmp.lt.s32.totalorder %s374_s10, %s374_s10 }
  0x1c   :  { %p381_p0 = por %p380_p13, %p379_p12 }
  0x1e   :  { %p382_p1 = pnand %p381_p0, %p375_p11 }
  0x20   :  { %385 = shalt.err (!%p382_p1)
}
  0x21   :  { %23 = dma.hbm_to_vmem [thread:$0]  %s596_s1, 1536, %s21_s18, [#allocation3]  }
  0x22   :  { %s438_s12 = smov [#allocation7]   ;;  %s386_s16 = scalar_lea.hbm %s598_s3, 384 }
  0x23   :  { %s40_s13 = sshll.u32 %s438_s12, 4  ;;  %p387_p2 = scmp.ne.s32.totalorder %s598_s3, %s386_s16  ;;  %s41_s13 = int_to_ptr.vmem [resolvable:$true] %s40_s13 }
  0x24   :  { %p390_p3 = scmp.lt.u32.totalorder %s386_s16, %s598_s3 }
  0x26   :  { %p392_p4 = pnand %p390_p3, %p387_p2 }
  0x28   :  { %395 = shalt.err (!%p392_p4)
}
  0x29   :  { %s396_s22 = scalar_lea.vmem %s41_s13, 384  ;;  %p401_p6 = scmp.lt.s32.totalorder %s41_s13, %s41_s13 }
  0x2a   :  { %p397_p5 = scmp.ne.s32.totalorder %s41_s13, %s396_s22  ;;  %p402_p7 = scmp.lt.s32.totalorder %s396_s22, %s396_s22 }
  0x2c   :  { %p403_p8 = por %p402_p7, %p401_p6 }
  0x2e   :  { %p404_p9 = pnand %p403_p8, %p397_p5 }
  0x30   :  { %407 = shalt.err (!%p404_p9)
}
  0x31   :  { %43 = dma.hbm_to_vmem [thread:$0]  %s598_s3, 384, %s41_s13, [#allocation6]  }
  0x32   :  { %430 = dma.done.wait [#allocation3], 1536  }
  0x33   :  { %431 = vsyncadd [#allocation3], 4294965760 }
  0x34   :  { %432 = dma.done.wait [#allocation6], 1920  }
  0x35   :  { %433 = vsyncadd [#allocation6], 4294965376  ;;  %v439_v0 = vmov 0   ;;  %v53_v1 = vld [vmem:[%s595_s0] sm:$0xf]  ;;  %v101_v2 = vlaneseq  ;;  %v509_v6 = vld [vmem:[#allocation7] sm:$0xff] }
  0x36   :  { %341 = vset.pattern.permute.xlu0 %v439_v0  ;;  %v523_v13 = vld [vmem:[#allocation7 + $0x8] sm:$0xff]  ;;  %v525_v14 = vld [vmem:[#allocation7 + $0x10] sm:$0xff]  ;;  %v57_v15 = vld [vmem:[#allocation2] sm:$0xff]  ;;  %vm316_vm0 = vcmask 1043456   ;;  %vm317_vm1 = vcmask 457732   ;;  %s440_s0 = smov [#allocation8]  }
  0x37   :  { %95 = vperm.xlu0 %341, %v53_v1   ;;  %v102_v3 = vshrl.u32 %v101_v2, 7  ;;  %v58_v18 = vld [vmem:[#allocation2 + $0x8] sm:$0xff]  ;;  %v59_v19 = vld [vmem:[#allocation2 + $0x10] sm:$0xff]  ;;  %v60_v20 = vld [vmem:[#allocation2 + $0x18] sm:$0xff]  ;;  %s326_s3 = sshll.u32 %s440_s0, 4  ;;  %s327_s3 = int_to_ptr.vmem [resolvable:$true] %s326_s3 }
  0x38   :  { %v61_v25 = vld [vmem:[#allocation2 + $0x20] sm:$0xff]  ;;  %v62_v26 = vld [vmem:[#allocation2 + $0x28] sm:$0xff]  ;;  %v63_v27 = vld [vmem:[#allocation2 + $0x30] sm:$0xff]  ;;  %s408_s25 = scalar_lea.vmem %s327_s3, 1536  ;;  %p413_p11 = scmp.lt.s32.totalorder %s327_s3, %s327_s3 }
  0x39   :  { %v505_v4 = vsub.s32 0, %v102_v3  ;;  %v507_v5 = vsub.s32 1, %v102_v3  ;;  %v511_v7 = vsub.s32 2, %v102_v3  ;;  %v513_v8 = vsub.s32 3, %v102_v3  ;;  %v69_v28 = vld [vmem:[#allocation5] sm:$0xff]  ;;  %v70_v29 = vld [vmem:[#allocation5 + $0x8] sm:$0xff]  ;;  %vm577_vm2 = vmor %vm317_vm1, %vm316_vm0  ;;  %p409_p10 = scmp.ne.s32.totalorder %s327_s3, %s408_s25  ;;  %p414_p12 = scmp.lt.s32.totalorder %s408_s25, %s408_s25 }
  0x3a   :  { %v515_v9 = vsub.s32 4, %v102_v3  ;;  %v517_v10 = vsub.s32 5, %v102_v3  ;;  %v519_v11 = vsub.s32 6, %v102_v3  ;;  %v521_v12 = vsub.s32 7, %v102_v3  ;;  %v64_v34 = vld [vmem:[#allocation2 + $0x38] sm:$0xff]  ;;  %v65_v35 = vld [vmem:[#allocation2 + $0x40] sm:$0xff] }
  0x3b   :  { %v104_v16 = vrot.slane %v509_v6, %v505_v4  ;;  %v108_v17 = vrot.slane %v509_v6, %v507_v5  ;;  %v112_v21 = vrot.slane %v509_v6, %v511_v7  ;;  %v116_v22 = vrot.slane %v509_v6, %v513_v8  ;;  %v66_v36 = vld [vmem:[#allocation2 + $0x48] sm:$0xff]  ;;  %v71_v37 = vld [vmem:[#allocation5 + $0x10] sm:$0xff]  ;;  %v72_v38 = vld [vmem:[#allocation5 + $0x18] sm:$0xff]  ;;  %p415_p13 = por %p414_p12, %p413_p11 }
  0x3c   :  { %v120_v23 = vrot.slane %v509_v6, %v515_v9  ;;  %v124_v24 = vrot.slane %v509_v6, %v517_v10  ;;  %v128_v30 = vrot.slane %v509_v6, %v519_v11  ;;  %v132_v31 = vrot.slane %v509_v6, %v521_v12  ;;  %v67_v43 = vld [vmem:[#allocation2 + $0x50] sm:$0xff]  ;;  %v73_v44 = vld [vmem:[#allocation5 + $0x20] sm:$0xff]  ;;  %v74_v45 = vld [vmem:[#allocation5 + $0x28] sm:$0xff] }
  0x3d   :  { %v136_v32 = vrot.slane %v523_v13, %v505_v4  ;;  %v140_v33 = vrot.slane %v523_v13, %v507_v5  ;;  %v144_v39 = vrot.slane %v523_v13, %v511_v7  ;;  %v148_v40 = vrot.slane %v523_v13, %v513_v8  ;;  %v75_v46 = vld [vmem:[#allocation5 + $0x30] sm:$0xff]  ;;  %v76_v51 = vld [vmem:[#allocation5 + $0x38] sm:$0xff]  ;;  %v77_v52 = vld [vmem:[#allocation5 + $0x40] sm:$0xff]  ;;  %p416_p0 = pnand %p415_p13, %p409_p10 }
  0x3e   :  { %v152_v41 = vrot.slane %v523_v13, %v515_v9  ;;  %v156_v42 = vrot.slane %v523_v13, %v517_v10  ;;  %v160_v47 = vrot.slane %v523_v13, %v519_v11  ;;  %v164_v48 = vrot.slane %v523_v13, %v521_v12  ;;  %v78_v53 = vld [vmem:[#allocation5 + $0x48] sm:$0xff]  ;;  %v68_v58 = vld [vmem:[#allocation2 + $0x58] sm:$0xff]  ;;  %v79_v59 = vld [vmem:[#allocation5 + $0x50] sm:$0xff] }
  0x3f   :  { %v168_v49 = vrot.slane %v525_v14, %v505_v4  ;;  %v172_v50 = vrot.slane %v525_v14, %v507_v5  ;;  %v81_v54 = vadd.f32 %v69_v28, %v57_v15  ;;  %v82_v55 = vadd.f32 %v70_v29, %v58_v18  ;;  %v80_v60 = vld [vmem:[#allocation5 + $0x58] sm:$0xff] }
  0x40   :  { %v176_v56 = vrot.slane %v525_v14, %v511_v7  ;;  %v180_v57 = vrot.slane %v525_v14, %v513_v8  ;;  %v83_v61 = vadd.f32 %v71_v37, %v59_v19  ;;  %v84_v62 = vadd.f32 %v72_v38, %v60_v20 }
  0x41   :  { %v184_v63 = vrot.slane %v525_v14, %v515_v9  ;;  %v188_v0 = vrot.slane %v525_v14, %v517_v10  ;;  %v85_v1 = vadd.f32 %v73_v44, %v61_v25  ;;  %v86_v2 = vadd.f32 %v74_v45, %v62_v26 }
  0x42   :  { %v87_v3 = vadd.f32 %v75_v46, %v63_v27  ;;  %v192_v4 = vrot.slane %v525_v14, %v519_v11  ;;  %v88_v5 = vadd.f32 %v76_v51, %v64_v34  ;;  %v89_v6 = vadd.f32 %v77_v52, %v65_v35 }
  0x43   :  { %v90_v7 = vadd.f32 %v78_v53, %v66_v36  ;;  %v196_v8 = vrot.slane %v525_v14, %v521_v12  ;;  %v91_v15 = vadd.f32 %v79_v59, %v67_v43  ;;  %v92_v18 = vadd.f32 %v80_v60, %v68_v58 }
  0xb6   :  { %v96_v13 = vpop.permute.xlu0 %95 }
  0xb7   :  { %v221_v9 = vmul.f32 %v104_v16, %v96_v13  ;;  %v222_v19 = vmul.f32 %v108_v17, %v96_v13  ;;  %v223_v10 = vmul.f32 %v112_v21, %v96_v13  ;;  %v224_v20 = vmul.f32 %v116_v22, %v96_v13 }
  0xb8   :  { %v225_v25 = vmul.f32 %v120_v23, %v96_v13  ;;  %v226_v26 = vmul.f32 %v124_v24, %v96_v13  ;;  %v227_v27 = vmul.f32 %v128_v30, %v96_v13  ;;  %v228_v28 = vmul.f32 %v132_v31, %v96_v13 }
  0xb9   :  { %v229_v11 = vmul.f32 %v136_v32, %v96_v13  ;;  %v230_v29 = vmul.f32 %v140_v33, %v96_v13  ;;  %v231_v34 = vmul.f32 %v144_v39, %v96_v13  ;;  %v232_v35 = vmul.f32 %v148_v40, %v96_v13 }
  0xba   :  { %v233_v36 = vmul.f32 %v152_v41, %v96_v13  ;;  %v234_v37 = vmul.f32 %v156_v42, %v96_v13  ;;  %v235_v12 = vmul.f32 %v160_v47, %v96_v13  ;;  %v236_v14 = vmul.f32 %v164_v48, %v96_v13 }
  0xbb   :  { %v237_v38 = vmul.f32 %v168_v49, %v96_v13  ;;  %v238_v43 = vmul.f32 %v172_v50, %v96_v13  ;;  %v239_v44 = vmul.f32 %v176_v56, %v96_v13  ;;  %v240_v45 = vmul.f32 %v180_v57, %v96_v13 }
  0xbc   :  { %v241_v16 = vmul.f32 %v184_v63, %v96_v13  ;;  %v242_v17 = vmul.f32 %v188_v0, %v96_v13  ;;  %v243_v21 = vmul.f32 %v192_v4, %v96_v13  ;;  %v244_v22 = vmul.f32 %v196_v8, %v96_v13 }
  0xbd   :  { %v269_v23 = vcombine.low %v221_v9, %v222_v19  ;;  %v270_v24 = vcombine.low %v223_v10, %v224_v20  ;;  %v271_v30 = vcombine.low %v225_v25, %v226_v26  ;;  %v272_v31 = vcombine.low %v227_v27, %v228_v28 }
  0xbe   :  { %v273_v32 = vcombine.low %v229_v11, %v230_v29  ;;  %v274_v33 = vcombine.low %v231_v34, %v232_v35  ;;  %v275_v39 = vcombine.low %v233_v36, %v234_v37  ;;  %v276_v40 = vcombine.low %v235_v12, %v236_v14 }
  0xbf   :  { %v277_v41 = vcombine.low %v237_v38, %v238_v43  ;;  %v278_v42 = vcombine.low %v239_v44, %v240_v45  ;;  %v279_v46 = vcombine.low %v241_v16, %v242_v17  ;;  %v280_v47 = vcombine.low %v243_v21, %v244_v22 }
  0xc0   :  { %v293_v48 = vadd.f32 %v269_v23, %v81_v54  ;;  %v294_v49 = vadd.f32 %v270_v24, %v82_v55  ;;  %v295_v50 = vadd.f32 %v271_v30, %v83_v61  ;;  %v296_v51 = vadd.f32 %v272_v31, %v84_v62 }
  0xc1   :  { %v297_v52 = vadd.f32 %v273_v32, %v85_v1  ;;  %v298_v53 = vadd.f32 %v274_v33, %v86_v2  ;;  %v299_v56 = vadd.f32 %v275_v39, %v87_v3  ;;  %v300_v57 = vadd.f32 %v276_v40, %v88_v5 }
  0xc2   :  { %v301_v59 = vadd.f32 %v277_v41, %v89_v6  ;;  %v302_v60 = vadd.f32 %v278_v42, %v90_v7  ;;  %v303_v63 = vadd.f32 %v279_v46, %v91_v15  ;;  %v304_v0 = vadd.f32 %v280_v47, %v92_v18  ;;  %305 = vst [vmem:[#allocation8] sm:$0xff] %v293_v48 }
  0xc3   :  { %306 = vst [vmem:[#allocation8 + $0x8] sm:$0xff] %v294_v49  ;;  %307 = vst [vmem:[#allocation8 + $0x10] sm:$0xff] %v295_v50 }
  0xc4   :  { %308 = vst [vmem:[#allocation8 + $0x18] sm:$0xff] %v296_v51  ;;  %309 = vst [vmem:[#allocation8 + $0x20] sm:$0xff] %v297_v52 }
  0xc5   :  { %310 = vst [vmem:[#allocation8 + $0x28] sm:$0xff] %v298_v53  ;;  %311 = vst [vmem:[#allocation8 + $0x30] sm:$0xff] %v299_v56 }
  0xc6   :  { %312 = vst [vmem:[#allocation8 + $0x38] sm:$0xff] %v300_v57  ;;  %313 = vst [vmem:[#allocation8 + $0x40] sm:$0xff] %v301_v59 }
  0xc7   :  { %314 = vst [vmem:[#allocation8 + $0x48] sm:$0xff] %v302_v60  ;;  %315 = vst [vmem:[#allocation8 + $0x50] sm:$0xff] %v303_v63 }
  0xc8   :  { %319 = vst.msk [vmem:[#allocation8 + $0x58] sm:$0xff] %vm577_vm2, %v304_v0 }
  0xc9   :  { %419 = shalt.err (!%p416_p0)
}
  0xca   :  { %s420_s28 = scalar_lea.hbm %s599_s4, 1536 }
  0xcb   :  { %p421_p1 = scmp.ne.s32.totalorder %s599_s4, %s420_s28  ;;  %p424_p2 = scmp.lt.u32.totalorder %s420_s28, %s599_s4 }
  0xcd   :  { %p426_p3 = pnand %p424_p2, %p421_p1 }
  0xcf   :  { %429 = shalt.err (!%p426_p3)
}
  0xd0   :  { %329 = dma.vmem_to_hbm [thread:$0]  %s327_s3, 1536, %s599_s4, [#allocation4]  }
  0xd1   :  { %434 = dma.done.wait [#allocation4], 1536  }
  0xd2   :  { %435 = vsyncadd [#allocation4], 4294965760 }
  0xd3   :  { %333 = vsyncpa [#allocation3], 1 }
  0xd4   :  { %334 = vsyncpa [#allocation6], 1 }
  0xd5   :  { %335 = vsyncpa [#allocation4], 1 }

</bundles_post_ra>
